<compile_context>
chip_gen: v7x
topology: tpu7x:2x2x1
jax: 0.10.0
libtpu: 0.0.40
codegen_flags: <defaults>
</compile_context>

<pallas_src>
import functools

import numpy as np
import jax
import jax.numpy as jnp
from jax.experimental import pallas as pl
from jax.experimental.pallas import tpu as pltpu


def _round_up(x, m):
    return ((x + m - 1) // m) * m


# ------------------------------------------------------------------ kernel
def time_encode_kernel(ts_ref, fp_ref, o_ref, *, num_groups, feat_dim):
    """One row tile of the packed output.

    ts_ref : (tm, K)        K timestamps per packed output row
    fp_ref : (2, K*D)       row 0 = tiled basis_freq, row 1 = tiled phase
    o_ref  : (tm, K*D)      o[r, g*D + d] = cos(ts[r, g] * freq[d] + phase[d])
    """
    width = num_groups * feat_dim
    t = ts_ref[...].astype(jnp.float32)            # (tm, K)
    f = fp_ref[0:1, :].astype(jnp.float32)         # (1, K*D)
    p = fp_ref[1:2, :].astype(jnp.float32)         # (1, K*D)
    tm = t.shape[0]

    # Expand ts (tm, K) -> (tm, K*D): lane j takes timestamp group j // D.
    # Pure VPU compare/select chain; no cross-lane data movement.
    t_full = jnp.broadcast_to(t[:, 0:1], (tm, width))
    if num_groups > 1:
        lane = jax.lax.broadcasted_iota(jnp.int32, (1, width), 1)
        for k in range(1, num_groups):
            sel = jnp.broadcast_to(lane >= (k * feat_dim), (tm, width))
            t_k = jnp.broadcast_to(t[:, k:k + 1], (tm, width))
            t_full = jnp.where(sel, t_k, t_full)

    # Multiply-add on the VPU, cosine on the EUP, cast only at the store.
    o_ref[...] = jnp.cos(t_full * f + p).astype(o_ref.dtype)


# ------------------------------------------------------------------ wrapper
@functools.partial(jax.jit, static_argnames=("tm", "out_dtype"))
def time_encode_pallas(ts, basis_freq, phase, *, tm=1024, out_dtype=jnp.float32):
    """ts: [B, L]; basis_freq, phase: [D]; returns [B, L, D] (out_dtype)."""
    B, L = ts.shape
    D = basis_freq.shape[0]
    M = B * L

    # Lane-packing factor: K timestamps per 128-lane output row.
    K = 128 // D if (D <= 128 and 128 % D == 0) else 1
    W = K * D

    # Packed row count (pad M up to a multiple of K only if needed).
    M_pad = _round_up(M, K)
    rows = M_pad // K

    ts_flat = ts.reshape(M).astype(jnp.float32)
    if M_pad != M:
        ts_flat = jnp.pad(ts_flat, (0, M_pad - M))
    ts2 = ts_flat.reshape(rows, K)                       # aligned to packing

    # Merged, resident parameter block: row 0 = freq tiled, row 1 = phase tiled.
    fp = jnp.stack(
        [jnp.tile(basis_freq.astype(jnp.float32), K),
         jnp.tile(phase.astype(jnp.float32), K)], axis=0)  # (2, W)

    # Row tiling: big tiles for bandwidth, >= 2 grid steps for v7x megacore
    # when there is enough work, full-array block for tiny inputs.
    if rows > tm:
        tm_eff = tm
    elif rows >= 16:
        tm_eff = _round_up(pl.cdiv(rows, 2), 8)
    else:
        tm_eff = rows
    grid_m = pl.cdiv(rows, tm_eff)

    kernel = functools.partial(time_encode_kernel, num_groups=K, feat_dim=D)

    out = pl.pallas_call(
        kernel,
        out_shape=jax.ShapeDtypeStruct((rows, W), out_dtype),
        grid_spec=pltpu.PrefetchScalarGridSpec(
            num_scalar_prefetch=0,
            grid=(grid_m,),
            in_specs=[
                pl.BlockSpec((tm_eff, K), lambda i: (i, 0)),   # ts row tile
                pl.BlockSpec((2, W), lambda i: (0, 0)),        # freq/phase (resident)
            ],
            out_specs=pl.BlockSpec((tm_eff, W), lambda i: (i, 0)),
        ),
        compiler_params=pltpu.CompilerParams(
            dimension_semantics=("parallel",)),
    )(ts2, fp)

    if M_pad != M:
        out = out.reshape(M_pad, D)[:M]
    return out.reshape(B, L, D)


# ------------------------------------------------------------------ reference
def time_encode_ref(ts, basis_freq, phase):
    map_ts = ts[..., None] * basis_freq[None, None, :] + phase[None, None, :]
    return jnp.cos(map_ts)


# ------------------------------------------------------------------ main
if __name__ == "__main__":
    expand_dim = 32          # time_dim
    B, L = 2, 8              # batch_size, seq_len

    key = jax.random.PRNGKey(0)
    kts, kph = jax.random.split(key, 2)

    # Timestamps (non-negative event times).
    ts = jax.random.uniform(kts, (B, L), jnp.float32, 0.0, 10.0)

    # Parameters exactly as in the PyTorch module's __init__.
    basis_freq = jnp.asarray(
        1.0 / 10 ** np.linspace(0, 9, expand_dim), dtype=jnp.float32)
    phase = jnp.zeros((expand_dim,), jnp.float32)
    # Perturb phase slightly so the phase-add path is exercised.
    phase = phase + 0.01 * jax.random.normal(kph, (expand_dim,), jnp.float32)

    out = time_encode_pallas(ts, basis_freq, phase)
    out = jax.block_until_ready(out)

    ref = time_encode_ref(ts, basis_freq, phase)
    assert out.shape == (B, L, expand_dim)
    assert jnp.max(jnp.abs(out - ref)) < 1e-4, "mismatch vs. JAX reference"

    print("KERNEL_OK")
</pallas_src>

<mosaic_0001>
module attributes {stable_mosaic.version = 11 : i64} {
  func.func @time_encode_kernel(%arg0: i32, %arg1: memref<4x4xf32, #tpu.memory_space<vmem>>, %arg2: memref<2x128xf32, #tpu.memory_space<vmem>>, %arg3: memref<4x128xf32, #tpu.memory_space<vmem>>) attributes {dimension_semantics = [#tpu.dimension_semantics<parallel>], iteration_bounds = array<i64: 1>, scalar_prefetch = 0 : i64, scratch_operands = 0 : i64, tpu.core_type = #tpu.core_type<tc>, window_params = [{transform_indices = @transform_0, window_bounds = array<i64: 4, 4>}, {pipeline_mode = #tpu.pipeline_mode<synchronous>, transform_indices = @transform_1, window_bounds = array<i64: 2, 128>}, {transform_indices = @transform_2, window_bounds = array<i64: 4, 128>}]} {
    %c0 = arith.constant 0 : index
    %c0_0 = arith.constant 0 : index
    %0 = vector.load %arg1[%c0, %c0_0] : memref<4x4xf32, #tpu.memory_space<vmem>>, vector<4x4xf32>
    %c0_1 = arith.constant 0 : index
    %c0_2 = arith.constant 0 : index
    %1 = vector.load %arg2[%c0_1, %c0_2] : memref<2x128xf32, #tpu.memory_space<vmem>>, vector<1x128xf32>
    %c1 = arith.constant 1 : index
    %c0_3 = arith.constant 0 : index
    %2 = vector.load %arg2[%c1, %c0_3] : memref<2x128xf32, #tpu.memory_space<vmem>>, vector<1x128xf32>
    %3 = vector.extract_strided_slice %0 {offsets = [0, 0], sizes = [4, 1], strides = [1, 1]} : vector<4x4xf32> to vector<4x1xf32>
    %4 = vector.shape_cast %3 : vector<4x1xf32> to vector<4x1xf32>
    %5 = vector.broadcast %4 : vector<4x1xf32> to vector<4x128xf32>
    %6 = tpu.iota {dimensions = array<i32: 1>} : vector<1x128xi32>
    %c32_i32 = arith.constant 32 : i32
    %7 = vector.broadcast %c32_i32 : i32 to vector<1x128xi32>
    %8 = arith.cmpi sge, %6, %7 : vector<1x128xi32>
    %9 = vector.shape_cast %8 : vector<1x128xi1> to vector<1x128xi1>
    %10 = vector.broadcast %9 : vector<1x128xi1> to vector<4x128xi1>
    %11 = vector.extract_strided_slice %0 {offsets = [0, 1], sizes = [4, 1], strides = [1, 1]} : vector<4x4xf32> to vector<4x1xf32>
    %12 = vector.shape_cast %11 : vector<4x1xf32> to vector<4x1xf32>
    %13 = vector.broadcast %12 : vector<4x1xf32> to vector<4x128xf32>
    %14 = arith.select %10, %13, %5 : vector<4x128xi1>, vector<4x128xf32>
    %c64_i32 = arith.constant 64 : i32
    %15 = vector.broadcast %c64_i32 : i32 to vector<1x128xi32>
    %16 = arith.cmpi sge, %6, %15 : vector<1x128xi32>
    %17 = vector.shape_cast %16 : vector<1x128xi1> to vector<1x128xi1>
    %18 = vector.broadcast %17 : vector<1x128xi1> to vector<4x128xi1>
    %19 = vector.extract_strided_slice %0 {offsets = [0, 2], sizes = [4, 1], strides = [1, 1]} : vector<4x4xf32> to vector<4x1xf32>
    %20 = vector.shape_cast %19 : vector<4x1xf32> to vector<4x1xf32>
    %21 = vector.broadcast %20 : vector<4x1xf32> to vector<4x128xf32>
    %22 = arith.select %18, %21, %14 : vector<4x128xi1>, vector<4x128xf32>
    %c96_i32 = arith.constant 96 : i32
    %23 = vector.broadcast %c96_i32 : i32 to vector<1x128xi32>
    %24 = arith.cmpi sge, %6, %23 : vector<1x128xi32>
    %25 = vector.shape_cast %24 : vector<1x128xi1> to vector<1x128xi1>
    %26 = vector.broadcast %25 : vector<1x128xi1> to vector<4x128xi1>
    %27 = vector.extract_strided_slice %0 {offsets = [0, 3], sizes = [4, 1], strides = [1, 1]} : vector<4x4xf32> to vector<4x1xf32>
    %28 = vector.shape_cast %27 : vector<4x1xf32> to vector<4x1xf32>
    %29 = vector.broadcast %28 : vector<4x1xf32> to vector<4x128xf32>
    %30 = arith.select %26, %29, %22 : vector<4x128xi1>, vector<4x128xf32>
    %31 = vector.broadcast %1 : vector<1x128xf32> to vector<4x128xf32>
    %32 = arith.mulf %30, %31 : vector<4x128xf32>
    %33 = vector.broadcast %2 : vector<1x128xf32> to vector<4x128xf32>
    %34 = arith.addf %32, %33 : vector<4x128xf32>
    %35 = math.cos %34 : vector<4x128xf32>
    %c0_4 = arith.constant 0 : index
    %c0_5 = arith.constant 0 : index
    %36 = vector.load %arg3[%c0_4, %c0_5] : memref<4x128xf32, #tpu.memory_space<vmem>>, vector<4x128xf32>
    tpu.vector_store %arg3[%c0_4, %c0_5], %35 {strides = array<i32>} : memref<4x128xf32, #tpu.memory_space<vmem>>, vector<4x128xf32>,
    return
  }
  func.func @transform_0(%arg0: i32) -> (i32, i32) {
    %c0_i32 = arith.constant 0 : i32
    %c0_i32_0 = arith.constant 0 : i32
    return %arg0, %c0_i32 : i32, i32
  }
  func.func @transform_1(%arg0: i32) -> (i32, i32) {
    %c0_i32 = arith.constant 0 : i32
    %c0_i32_0 = arith.constant 0 : i32
    %c0_i32_1 = arith.constant 0 : i32
    return %c0_i32, %c0_i32_0 : i32, i32
  }
  func.func @transform_2(%arg0: i32) -> (i32, i32) {
    %c0_i32 = arith.constant 0 : i32
    %c0_i32_0 = arith.constant 0 : i32
    return %arg0, %c0_i32 : i32, i32
  }
}

</mosaic_0001>

<bundles_post_ra>
// kernel: tile.18
= control target key start
LH: loop header
LB: loop body
LE: loop exit
PB: predicated region body
PF: predicated region fallthrough
CT: control target
= control target key end

     0   :  { %vm7_vm0 = vcmask 261120   ;;  %s37_s8 = smov 32   ;;  %s38_s9 = smov 64   ;;  %vm13_vm1 = vcmask 1048320   ;;  %vm19_vm2 = vcmask 785920   ;;  %vm25_vm3 = vcmask 523520   ;;  %s55_s0 = inlined_call_operand.vmem [shape: f32[4,32], index: 0, kind: input, shape index: {}]   ;;  %s56_s1 = inlined_call_operand.vmem [shape: f32[1,128], index: 1, kind: output, shape index: {}]  }
   0x1   :  { %v4_v0 = vld [vmem:[%s55_s0] sm:$0xf]  ;;  %s36_s0 = smov 96  }
   0x2   :  { %5 = vst [vmem:[#allocation1] sm:$0xf] %v4_v0 }
   0x9   :  { %v10_v1 = vld [vmem:[#allocation1 + $0x3] sm:$0x1]   ;;  %v22_v2 = vld [vmem:[#allocation1 + $0x1] sm:$0x1]   ;;  %v6_v3 = vld [vmem:[#allocation1] sm:$0x1]  }
   0xa   :  { %11 = vrot.lane.b32.xlu0 %v10_v1, %s36_s0  ;;  %23 = vrot.lane.b32.xlu1 %v22_v2, %s37_s8  ;;  %v16_v4 = vld [vmem:[#allocation1 + $0x2] sm:$0x1]   ;;  %8 = vst.msk [vmem:[#allocation0] sm:$0x1] %vm7_vm0, %v6_v3  }
   0xe   :  { %17 = vrot.lane.b32.xlu0 %v16_v4, %s38_s9 }
  0x7c   :  { %v12_v5 = vpop.permute.xlu0 %11   ;;  %v24_v6 = vpop.permute.xlu1 %23  }
  0x7d   :  { %14 = vst.msk [vmem:[#allocation0] sm:$0x1] %vm13_vm1, %v12_v5  }
  0x80   :  { %v18_v7 = vpop.permute.xlu0 %17  }
  0x81   :  { %20 = vst.msk [vmem:[#allocation0] sm:$0x1] %vm19_vm2, %v18_v7  }
  0x82   :  { %26 = vst.msk [vmem:[#allocation0] sm:$0x1] %vm25_vm3, %v24_v6  }
  0x89   :  { %v30_v8 = vld [vmem:[#allocation0] sm:$0x1] }
  0x8a   :  { %32 = vst [vmem:[%s56_s1] sm:$0x1] %v30_v8 }

// kernel: tile.13
= control target key start
LH: loop header
LB: loop body
LE: loop exit
PB: predicated region body
PF: predicated region fallthrough
CT: control target
= control target key end

     0   :  { %s22_s0 = inlined_call_operand.vmem [shape: f32[32], index: 0, kind: input, shape index: {}]   ;;  %s23_s1 = inlined_call_operand.vmem [shape: f32[4,32], index: 1, kind: output, shape index: {}]  }
   0x1   :  { %v4_v0 = vld [vmem:[%s22_s0] ss:$0 sm:$0xff] }
   0x2   :  { %5 = vst [vmem:[%s23_s1] sm:$0xf] %v4_v0 }

// kernel: time_encode_pallas.1
= control target key start
LH: loop header
LB: loop body
LE: loop exit
PB: predicated region body
PF: predicated region fallthrough
CT: control target
= control target key end

     0   :  { %v192_v0 = vmov 0   ;;  %v193_v2 = vmov 2   ;;  %v194_v3 = vmov 1   ;;  %v195_v4 = vmov 3   ;;  %s250_s0 = inlined_call_operand.vmem [shape: f32[4,4], index: 0, kind: input, shape index: {}]   ;;  %s251_s1 = inlined_call_operand.vmem [shape: f32[2,128], index: 1, kind: input, shape index: {}]   ;;  %s252_s2 = inlined_call_operand.vmem [shape: f32[4,128], index: 2, kind: output, shape index: {}]  }
   0x1   :  { %183 = vset.pattern.permute.xlu0 %v192_v0  ;;  %v11_v1 = vld [vmem:[%s250_s0] sm:$0xf]  ;;  %185 = vset.pattern.permute.xlu1 %v193_v2  ;;  %v19_v5 = vlaneseq  ;;  %v196_v28 = vmov 683565275   ;;  %v197_v30 = vmov 2475754826  }
   0x2   :  { %16 = vperm.xlu0 %183, %v11_v1   ;;  %33 = vperm.xlu1 %185, %v11_v1   ;;  %v163_v12 = vld [vmem:[%s251_s1] ss:$0 sm:$0xff]  ;;  %v164_v14 = vld [vmem:[%s251_s1 + $0x1] ss:$0 sm:$0xff]  ;;  %v198_v33 = vmov 2131351028  }
   0x3   :  { %v20_v6 = vand.u32 127, %v19_v5  ;;  %v199_v36 = vmov 2102212464   ;;  %v200_v39 = vmov 920167782  }
   0x4   :  { %v201_v42 = vmov 1326507024  }
   0x5   :  { %vm21_vm0 = vcmp.ge.s32.totalorder %v20_v6, 32  ;;  %vm29_vm1 = vcmp.ge.s32.totalorder %v20_v6, 64  ;;  %vm37_vm2 = vcmp.ge.s32.totalorder %v20_v6, 96 }
   0x6   :  { %184 = vset.pattern.permute.xlu0 %v194_v3  ;;  %186 = vset.pattern.permute.xlu1 %v195_v4 }
   0x7   :  { %25 = vperm.xlu0 %184, %v11_v1   ;;  %41 = vperm.xlu1 %186, %v11_v1  }
   0xb   :  { %187 = vset.pattern.permute.xlu0 %v195_v4 }
  0x81   :  { %v17_v7 = vpop.permute.xlu0 %16  ;;  %v34_v8 = vpop.permute.xlu1 %33 }
  0x86   :  { %v26_v9 = vpop.permute.xlu0 %25  ;;  %v42_v10 = vpop.permute.xlu1 %41 }
  0x87   :  { %v28_v11 = vsel %vm21_vm0, %v26_v9, %v17_v7 }
  0x88   :  { %v36_v13 = vsel %vm29_vm1, %v34_v8, %v28_v11 }
  0x89   :  { %v44_v15 = vsel %vm37_vm2, %v42_v10, %v36_v13 }
  0x8a   :  { %v49_v16 = vmul.f32 %v163_v12, %v44_v15 }
  0x8c   :  { %v226_v17 = vadd.f32 %v164_v14, %v49_v16 }
  0x8e   :  { %v58_v18 = vand.u32 2139095040, %v226_v17  ;;  %v55_v22 = vand.u32 2147483647, %v226_v17  ;;  %vm57_vm10 = vcmp.lt.s32.totalorder %v226_v17, 0  ;;  %vm147_vm15 = vweird.f32 %v226_v17 }
  0x90   :  { %v59_v19 = vshrl.u32 %v58_v18, 23  ;;  %v62_v25 = vand.u32 8388607, %v55_v22  ;;  %vm56_vm11 = vcmp.le.f32.partialorder %v55_v22, 0.7853982 }
  0x92   :  { %v165_v20 = vadd.s32 4294967169, %v59_v19  ;;  %v63_v44 = vor.u32 8388608, %v62_v25 }
  0x94   :  { %v65_v21 = vadd.s32 1, %v165_v20  ;;  %v103_v58 = vshll.u32 %v63_v44, 8 }
  0x96   :  { %vm66_vm3 = vcmp.gt.s32.totalorder %v65_v21, 0 }
  0x97   :  { %v67_v23 = vsel %vm66_vm3, %v65_v21, 0 }
  0x98   :  { %v69_v24 = vand.u32 31, %v67_v23  ;;  %v68_v27 = vshrl.u32 %v67_v23, 5 }
  0x9a   :  { %v70_v26 = vsub.s32 32, %v69_v24  ;;  %v72_v29 = vshll.u32 %v196_v28, %v69_v24  ;;  %v75_v31 = vshll.u32 %v197_v30, %v69_v24  ;;  %v78_v35 = vshll.u32 %v198_v33, %v69_v24 }
  0x9b   :  { %v81_v38 = vshll.u32 %v199_v36, %v69_v24  ;;  %v84_v41 = vshll.u32 %v200_v39, %v69_v24  ;;  %vm87_vm4 = vcmp.lt.s32.totalorder %v68_v27, 1  ;;  %vm90_vm5 = vcmp.lt.s32.totalorder %v68_v27, 4 }
  0x9c   :  { %v73_v32 = vshrl.u32 %v197_v30, %v70_v26  ;;  %v76_v34 = vshrl.u32 %v198_v33, %v70_v26  ;;  %v79_v37 = vshrl.u32 %v199_v36, %v70_v26  ;;  %v82_v40 = vshrl.u32 %v200_v39, %v70_v26 }
  0x9d   :  { %v85_v43 = vshrl.u32 %v201_v42, %v70_v26  ;;  %v71_v53 = vshrl.u32 %v196_v28, %v70_v26  ;;  %vm89_vm6 = vcmp.lt.s32.totalorder %v68_v27, 3  ;;  %vm88_vm7 = vcmp.lt.s32.totalorder %v68_v27, 2 }
  0x9e   :  { %v74_v45 = vor.u32 %v73_v32, %v72_v29  ;;  %v77_v46 = vor.u32 %v76_v34, %v75_v31  ;;  %v80_v47 = vor.u32 %v79_v37, %v78_v35  ;;  %v83_v48 = vor.u32 %v82_v40, %v81_v38 }
  0x9f   :  { %v86_v49 = vor.u32 %v85_v43, %v84_v41 }
  0xa0   :  { %v92_v50 = vsel %vm90_vm5, %v80_v47, 2102212464  ;;  %v95_v51 = vsel %vm87_vm4, %v74_v45, %v77_v46  ;;  %v99_v52 = vsel %vm87_vm4, %v77_v46, %v80_v47  ;;  %v96_v54 = vsel %vm90_vm5, %v83_v48, 920167782 }
  0xa1   :  { %v100_v55 = vsel %vm90_vm5, %v86_v49, 1326507024  ;;  %v97_v56 = vsel %vm89_vm6, %v80_v47, %v96_v54  ;;  %v91_v59 = vsel %vm87_vm4, %v71_v53, %v74_v45  ;;  %v93_v60 = vsel %vm89_vm6, %v77_v46, %v92_v50 }
  0xa2   :  { %v101_v57 = vsel %vm89_vm6, %v83_v48, %v100_v55  ;;  %v98_v61 = vsel %vm88_vm7, %v95_v51, %v97_v56  ;;  %v94_v3 = vsel %vm88_vm7, %v91_v59, %v93_v60 }
  0xa3   :  { %v102_v62 = vsel %vm88_vm7, %v99_v52, %v101_v57  ;;  %v235_v1 = vmul.u32.u64.low %v103_v58, %v98_v61  ;;  %v236_v2 = vmul.u32.u64.high %v103_v58, %v98_v61, %v235_v1  ;;  %v110_v5 = vmul.u32 %v103_v58, %v94_v3 }
  0xa4   :  { %v232_v63 = vmul.u32.u64.low %v103_v58, %v102_v62  ;;  %v233_v0 = vmul.u32.u64.high %v103_v58, %v102_v62, %v232_v63 }
  0xa5   :  { %v113_v4 = vadd.s32 1, %v236_v2 }
  0xa6   :  { %vm112_vm8 = vc.u32 %v233_v0, %v235_v1  ;;  %v111_v18 = vadd.s32 %v235_v1, %v233_v0 }
  0xa7   :  { %v114_v6 = vsel %vm112_vm8, %v113_v4, %v236_v2 }
  0xa8   :  { %v115_v7 = vadd.s32 %v114_v6, %v110_v5 }
  0xaa   :  { %v116_v8 = vadd.s32 536870912, %v115_v7 }
  0xac   :  { %v117_v9 = vshrl.u32 %v116_v8, 30 }
  0xae   :  { %v118_v10 = vshll.u32 %v117_v9, 30  ;;  %v141_v33 = vsub.s32 4, %v117_v9 }
  0xb0   :  { %v119_v11 = vsub.s32 %v115_v7, %v118_v10  ;;  %v142_v35 = vsel %vm57_vm10, %v141_v33, %v117_v9 }
  0xb1   :  { %v144_v36 = vsel %vm56_vm11, 0, %v142_v35 }
  0xb2   :  { %v121_v12 = vsub.s32 0, %v119_v11  ;;  %v148_v37 = vand.u32 3, %v144_v36 }
  0xb4   :  { %v166_v13 = vmin.u32 %v121_v12, %v119_v11  ;;  %vm153_vm12 = vcmp.eq.s32.totalorder %v148_v37, 2  ;;  %vm150_vm13 = vcmp.eq.s32.totalorder %v148_v37, 0  ;;  %vm149_vm14 = vcmp.lt.s32.totalorder %v148_v37, 2 }
  0xb6   :  { %v123_v14 = vclz %v166_v13 }
  0xb8   :  { %v167_v15 = vadd.s32 4294967294, %v123_v14 }
  0xba   :  { %vm168_vm9 = vcmp.lt.s32.totalorder %v167_v15, 0 }
  0xbb   :  { %v126_v16 = vsel %vm168_vm9, 0, %v167_v15 }
  0xbc   :  { %v127_v19 = vsub.s32 32, %v126_v16  ;;  %v131_v20 = vsub.s32 4294967266, %v126_v16  ;;  %v128_v21 = vshll.u32 %v119_v11, %v126_v16 }
  0xbe   :  { %v129_v23 = vshrl.u32 %v111_v18, %v127_v19  ;;  %v132_v24 = vadd.s32 127, %v131_v20 }
  0xc0   :  { %v130_v25 = vor.u32 %v129_v23, %v128_v21  ;;  %v133_v26 = vshll.u32 %v132_v24, 23 }
  0xc2   :  { %v134_v27 = vor.u32 4788187, %v133_v26  ;;  %v137_v29 = vcvt.s32.f32 %v130_v25 }
  0xc4   :  { %v135_v28 = vand.u32 2147483647, %v134_v27 }
  0xc6   :  { %v138_v30 = vmul.f32 %v137_v29, %v135_v28 }
  0xc8   :  { %v139_v31 = vxor.u32 2147483648, %v138_v30 }
  0xca   :  { %v140_v32 = vsel %vm57_vm10, %v139_v31, %v138_v30 }
  0xcb   :  { %v143_v34 = vsel %vm56_vm11, %v226_v17, %v140_v32 }
  0xcc   :  { %188 = vcosq.f32 %v143_v34 }
  0xcd   :  { %190 = vsinq.f32 %v143_v34 }
  0xd6   :  { %v189_v38 = vpop.eup %188 }
  0xd7   :  { %v191_v39 = vpop.eup %190  ;;  %v154_v40 = vxor.u32 2147483648, %v189_v38 }
  0xd8   :  { %v151_v41 = vxor.u32 2147483648, %v191_v39 }
  0xd9   :  { %v155_v42 = vsel %vm153_vm12, %v154_v40, %v191_v39 }
  0xda   :  { %v152_v43 = vsel %vm150_vm13, %v189_v38, %v151_v41 }
  0xdb   :  { %v156_v22 = vsel %vm149_vm14, %v152_v43, %v155_v42 }
  0xdc   :  { %v157_v44 = vsel %vm147_vm15, nan, %v156_v22 }
  0xdd   :  { %158 = vst [vmem:[%s252_s2] sm:$0xf] %v157_v44 }

</bundles_post_ra>
